<compile_context>
chip_gen: v6e
topology: v6e:2x2x1
jax: 0.10.0
libtpu: 0.0.40
codegen_flags: <defaults>
</compile_context>

<pallas_src>
import jax
import jax.numpy as jnp
import numpy as np
from jax import lax
from jax.experimental import pallas as pl
from jax.experimental.pallas import tpu as pltpu


def _round_up(x: int, m: int) -> int:
    return (x + m - 1) // m * m


def _make_kernel(TB: int, TK: int, D_pad: int, C_pad: int):
    """Kernel for a fixed (bags-per-tile, tokens-per-chunk, D_pad, C_pad)."""

    def kernel(starts_ref, ends_ref, inv_ref,   # (TB, 1) per-bag VMEM inputs
               gath_ref, w_ref, b_ref,          # (TK, D_pad), (D_pad, C_pad), (1, C_pad)
               out_ref,                         # (TB, C_pad) output block
               acc_ref):                        # (TB, D_pad) f32 VMEM scratch
        k = pl.program_id(1)

        @pl.when(k == 0)
        def _():
            acc_ref[...] = jnp.zeros_like(acc_ref)

        # Global token index of every column of this chunk: (TB, TK).
        tok = lax.broadcasted_iota(jnp.int32, (TB, TK), 1) + k * TK
        # Bag-membership selection matrix, pre-scaled by the exact 1/count so
        # the matmul below directly produces the bag means.  Pure VPU work.
        in_bag = (tok >= starts_ref[...]) & (tok < ends_ref[...])
        sel = jnp.where(in_bag, inv_ref[...], 0.0).astype(gath_ref.dtype)

        # Segment mean as an MXU matmul: (TB, TK) @ (TK, D_pad), f32 accumulate.
        acc_ref[...] += jnp.dot(sel, gath_ref[...],
                                preferred_element_type=jnp.float32)

        @pl.when(k == pl.num_programs(1) - 1)
        def _():
            logits = jnp.dot(acc_ref[...].astype(w_ref.dtype), w_ref[...],
                             preferred_element_type=jnp.float32) + b_ref[...]
            out_ref[...] = logits.astype(out_ref.dtype)

    return kernel


def embedding_bag_classifier(text, offsets, emb_table, fc_w, fc_b,
                             *, bags_per_tile=None, tokens_per_chunk=None,
                             compute_dtype=jnp.float32):
    """text: int32[T], offsets: int32[B], emb_table: f32[V,D],
       fc_w: f32[C,D] (PyTorch layout), fc_b: f32[C]  ->  logits f32[B,C]."""
    T = int(text.shape[0])
    B = int(offsets.shape[0])
    V, D = map(int, emb_table.shape)
    C = int(fc_w.shape[0])

    # Lane-dense padding of the feature / class dims.
    D_pad = _round_up(D, 128)
    C_pad = _round_up(C, 128)

    # Bags per grid step: multiple of 8.  TB=256 fills the v6e/v7x 256-wide MXU
    # when B is large while keeping num_tiles >= 2 (so v7x's parallel axis
    # spans both TensorCores); on v5e TB=128 already matches the MXU, pass
    # bags_per_tile=128 there if desired.
    if bags_per_tile is None:
        bags_per_tile = 256 if B >= 512 else min(128, _round_up(B, 8))
    TB = int(bags_per_tile)
    B_pad = _round_up(B, TB)
    num_tiles = B_pad // TB

    # Tokens per chunk: lane-dense multiple of 128, streamed through VMEM.
    if tokens_per_chunk is None:
        tokens_per_chunk = min(512, _round_up(max(T, 1), 128))
    TK = int(tokens_per_chunk)
    T_pad = _round_up(max(T, 1), TK)
    num_chunks = T_pad // TK

    # --- wrapper-side preprocessing (single vectorized XLA ops) -------------
    text = jnp.clip(text.astype(jnp.int32), 0, V - 1)        # one clip, not per-token
    offsets = offsets.astype(jnp.int32)
    ends = jnp.concatenate([offsets[1:], jnp.array([T], dtype=jnp.int32)])
    counts = ends - offsets                                    # non-monotonic -> empty bag
    inv = 1.0 / jnp.maximum(counts, 1).astype(jnp.float32)     # exact reciprocal (wrapper)

    pad_b = B_pad - B
    starts_p = jnp.pad(offsets, (0, pad_b), constant_values=T).reshape(B_pad, 1)
    ends_p = jnp.pad(ends, (0, pad_b), constant_values=T).reshape(B_pad, 1)
    inv_p = jnp.pad(inv, (0, pad_b), constant_values=1.0).reshape(B_pad, 1)

    # Pre-gather token embeddings once (review-sanctioned): the kernel then
    # only sees the (TK, D_pad) chunk it needs, never the full V x D table.
    gathered = jnp.take(emb_table.astype(compute_dtype), text, axis=0)      # (T, D)
    gathered = jnp.pad(gathered, ((0, T_pad - T), (0, D_pad - D)))           # (T_pad, D_pad)

    w_t = jnp.pad(fc_w.astype(compute_dtype).T,
                  ((0, D_pad - D), (0, C_pad - C)))                          # (D_pad, C_pad)
    b2d = jnp.pad(fc_b.astype(jnp.float32).reshape(1, C),
                  ((0, 0), (0, C_pad - C)))                                  # (1, C_pad)

    kernel = _make_kernel(TB, TK, D_pad, C_pad)

    grid_spec = pltpu.PrefetchScalarGridSpec(
        num_scalar_prefetch=0,
        grid=(num_tiles, num_chunks),
        in_specs=[
            pl.BlockSpec((TB, 1), lambda i, k: (i, 0)),         # bag starts
            pl.BlockSpec((TB, 1), lambda i, k: (i, 0)),         # bag ends
            pl.BlockSpec((TB, 1), lambda i, k: (i, 0)),         # exact 1/count
            pl.BlockSpec((TK, D_pad), lambda i, k: (k, 0)),     # gathered token embeddings
            pl.BlockSpec((D_pad, C_pad), lambda i, k: (0, 0)),  # fc W^T (grid-invariant)
            pl.BlockSpec((1, C_pad), lambda i, k: (0, 0)),      # fc bias (grid-invariant)
        ],
        out_specs=pl.BlockSpec((TB, C_pad), lambda i, k: (i, 0)),
        scratch_shapes=[pltpu.VMEM((TB, D_pad), jnp.float32)],
    )

    itemsize = jnp.dtype(compute_dtype).itemsize
    cost = pl.CostEstimate(
        flops=2 * num_tiles * TB * T_pad * D_pad + 2 * B_pad * D_pad * C_pad,
        transcendentals=0,
        bytes_accessed=(num_tiles * T_pad * D_pad * itemsize   # gathered, re-read per tile
                        + D_pad * C_pad * itemsize             # W^T
                        + 3 * B_pad * 4                        # starts/ends/inv
                        + B_pad * C_pad * 4),                  # output
    )

    out = pl.pallas_call(
        kernel,
        out_shape=jax.ShapeDtypeStruct((B_pad, C_pad), jnp.float32),
        grid_spec=grid_spec,
        compiler_params=pltpu.CompilerParams(
            dimension_semantics=("parallel", "arbitrary"),   # bag tiles shard over v7x TCs
            vmem_limit_bytes=32 * 1024 * 1024),              # safe on v5e/v6e/v7x
        cost_estimate=cost,
    )(starts_p, ends_p, inv_p, gathered, w_t, b2d)

    # TODO(synk): for large B keep the padded (B_pad, C_pad) layout end-to-end
    # in the consumer to avoid this post-call slice copy / write amplification.
    return out[:B, :C]


def _reference(text, offsets, emb_table, fc_w, fc_b):
    """Pure-JAX reference matching nn.EmbeddingBag(mode='mean') + nn.Linear."""
    T = text.shape[0]
    B = offsets.shape[0]
    ends = jnp.concatenate([offsets[1:], jnp.array([T], dtype=offsets.dtype)])
    gathered = emb_table[text]                         # (T, D)
    outs = []
    for b in range(B):
        s = int(offsets[b]); e = int(ends[b])
        if e > s:
            outs.append(gathered[s:e].mean(axis=0))
        else:
            outs.append(jnp.zeros((emb_table.shape[1],), jnp.float32))
    embedded = jnp.stack(outs, axis=0)                 # (B, D)
    return embedded @ fc_w.T + fc_b


if __name__ == "__main__":
    # Model hyperparameters (small, consistent with the module's __init__).
    vocab_size, embed_dim, num_class = 64, 32, 8
    B, T = 4, 16

    key = jax.random.PRNGKey(0)
    k_emb, k_fcw, k_txt = jax.random.split(key, 3)

    initrange = 0.5
    emb_table = jax.random.uniform(k_emb, (vocab_size, embed_dim),
                                   jnp.float32, -initrange, initrange)
    fc_w = jax.random.uniform(k_fcw, (num_class, embed_dim),
                              jnp.float32, -initrange, initrange)
    fc_b = jnp.zeros((num_class,), jnp.float32)

    text = jax.random.randint(k_txt, (T,), 0, vocab_size, dtype=jnp.int32)
    offsets = jnp.array([0, 3, 7, 12], dtype=jnp.int32)   # B bags over the flat text

    out = embedding_bag_classifier(text, offsets, emb_table, fc_w, fc_b)
    out = jax.block_until_ready(out)

    ref = _reference(text, offsets, emb_table, fc_w, fc_b)
    np.testing.assert_allclose(np.asarray(out), np.asarray(ref),
                               rtol=1e-5, atol=1e-5)
    print("KERNEL_OK")
</pallas_src>

<mosaic_0001>
module attributes {stable_mosaic.version = 11 : i64} {
  func.func @kernel(%arg0: i32, %arg1: i32, %arg2: memref<8x1xi32, #tpu.memory_space<vmem>>, %arg3: memref<8x1xi32, #tpu.memory_space<vmem>>, %arg4: memref<8x1xf32, #tpu.memory_space<vmem>>, %arg5: memref<128x128xf32, #tpu.memory_space<vmem>>, %arg6: memref<128x128xf32, #tpu.memory_space<vmem>>, %arg7: memref<1x128xf32, #tpu.memory_space<vmem>>, %arg8: memref<8x128xf32, #tpu.memory_space<vmem>>, %arg9: memref<8x128xf32, #tpu.memory_space<vmem>>) attributes {dimension_semantics = [#tpu.dimension_semantics<parallel>, #tpu.dimension_semantics<arbitrary>], iteration_bounds = array<i64: 1, 1>, scalar_prefetch = 0 : i64, scratch_operands = 1 : i64, tpu.core_type = #tpu.core_type<tc>, window_params = [{transform_indices = @transform_0, window_bounds = array<i64: 8, 1>}, {transform_indices = @transform_1, window_bounds = array<i64: 8, 1>}, {transform_indices = @transform_2, window_bounds = array<i64: 8, 1>}, {transform_indices = @transform_3, window_bounds = array<i64: 128, 128>}, {pipeline_mode = #tpu.pipeline_mode<synchronous>, transform_indices = @transform_4, window_bounds = array<i64: 128, 128>}, {pipeline_mode = #tpu.pipeline_mode<synchronous>, transform_indices = @transform_5, window_bounds = array<i64: 1, 128>}, {transform_indices = @transform_6, window_bounds = array<i64: 8, 128>}]} {
    %c0_i32 = arith.constant 0 : i32
    %0 = arith.cmpi eq, %arg1, %c0_i32 : i32
    %1 = arith.extui %0 : i1 to i32
    %c0_i32_0 = arith.constant 0 : i32
    %2 = arith.cmpi ne, %1, %c0_i32_0 : i32
    scf.if %2 {
      %cst_15 = arith.constant 0.000000e+00 : f32
      %27 = vector.broadcast %cst_15 : f32 to vector<8x128xf32>
      %c0_16 = arith.constant 0 : index
      %c0_17 = arith.constant 0 : index
      %28 = vector.load %arg9[%c0_16, %c0_17] : memref<8x128xf32, #tpu.memory_space<vmem>>, vector<8x128xf32>
      tpu.vector_store %arg9[%c0_16, %c0_17], %27 {strides = array<i32>} : memref<8x128xf32, #tpu.memory_space<vmem>>, vector<8x128xf32>,
    } else {
    }
    %3 = tpu.iota {dimensions = array<i32: 1>} : vector<8x128xi32>
    %c128_i32 = arith.constant 128 : i32
    %4 = arith.muli %arg1, %c128_i32 : i32
    %5 = vector.broadcast %4 : i32 to vector<8x128xi32>
    %6 = arith.addi %3, %5 : vector<8x128xi32>
    %c0 = arith.constant 0 : index
    %c0_1 = arith.constant 0 : index
    %7 = vector.load %arg2[%c0, %c0_1] : memref<8x1xi32, #tpu.memory_space<vmem>>, vector<8x1xi32>
    %8 = vector.broadcast %7 : vector<8x1xi32> to vector<8x128xi32>
    %9 = arith.cmpi sge, %6, %8 : vector<8x128xi32>
    %c0_2 = arith.constant 0 : index
    %c0_3 = arith.constant 0 : index
    %10 = vector.load %arg3[%c0_2, %c0_3] : memref<8x1xi32, #tpu.memory_space<vmem>>, vector<8x1xi32>
    %11 = vector.broadcast %10 : vector<8x1xi32> to vector<8x128xi32>
    %12 = arith.cmpi slt, %6, %11 : vector<8x128xi32>
    %13 = arith.andi %9, %12 : vector<8x128xi1>
    %c0_4 = arith.constant 0 : index
    %c0_5 = arith.constant 0 : index
    %14 = vector.load %arg4[%c0_4, %c0_5] : memref<8x1xf32, #tpu.memory_space<vmem>>, vector<8x1xf32>
    %cst = arith.constant 0.000000e+00 : f32
    %15 = vector.shape_cast %14 : vector<8x1xf32> to vector<8x1xf32>
    %16 = vector.broadcast %15 : vector<8x1xf32> to vector<8x128xf32>
    %17 = vector.broadcast %cst : f32 to vector<8x128xf32>
    %18 = arith.select %13, %16, %17 : vector<8x128xi1>, vector<8x128xf32>
    %c0_6 = arith.constant 0 : index
    %c0_7 = arith.constant 0 : index
    %19 = vector.load %arg9[%c0_6, %c0_7] : memref<8x128xf32, #tpu.memory_space<vmem>>, vector<8x128xf32>
    %c0_8 = arith.constant 0 : index
    %c0_9 = arith.constant 0 : index
    %20 = vector.load %arg5[%c0_8, %c0_9] : memref<128x128xf32, #tpu.memory_space<vmem>>, vector<128x128xf32>
    %cst_10 = arith.constant dense<0.000000e+00> : vector<8x128xf32>
    %21 = tpu.matmul %18, %20, %cst_10 {dimension_numbers = #tpu.dot_dimension_numbers<[1], [0], [0], [1], [0, 0, 1, 1], [], []>} : vector<8x128xf32>, vector<128x128xf32>, vector<8x128xf32> -> vector<8x128xf32>
    %22 = arith.addf %19, %21 : vector<8x128xf32>
    %c0_11 = arith.constant 0 : index
    %c0_12 = arith.constant 0 : index
    %23 = vector.load %arg9[%c0_11, %c0_12] : memref<8x128xf32, #tpu.memory_space<vmem>>, vector<8x128xf32>
    tpu.vector_store %arg9[%c0_11, %c0_12], %22 {strides = array<i32>} : memref<8x128xf32, #tpu.memory_space<vmem>>, vector<8x128xf32>,
    %c0_i32_13 = arith.constant 0 : i32
    %24 = arith.cmpi eq, %arg1, %c0_i32_13 : i32
    %25 = arith.extui %24 : i1 to i32
    %c0_i32_14 = arith.constant 0 : i32
    %26 = arith.cmpi ne, %25, %c0_i32_14 : i32
    scf.if %26 {
      %c0_15 = arith.constant 0 : index
      %c0_16 = arith.constant 0 : index
      %27 = vector.load %arg9[%c0_15, %c0_16] : memref<8x128xf32, #tpu.memory_space<vmem>>, vector<8x128xf32>
      %c0_17 = arith.constant 0 : index
      %c0_18 = arith.constant 0 : index
      %28 = vector.load %arg6[%c0_17, %c0_18] : memref<128x128xf32, #tpu.memory_space<vmem>>, vector<128x128xf32>
      %cst_19 = arith.constant dense<0.000000e+00> : vector<8x128xf32>
      %29 = tpu.matmul %27, %28, %cst_19 {dimension_numbers = #tpu.dot_dimension_numbers<[1], [0], [0], [1], [0, 0, 1, 1], [], []>} : vector<8x128xf32>, vector<128x128xf32>, vector<8x128xf32> -> vector<8x128xf32>
      %c0_20 = arith.constant 0 : index
      %c0_21 = arith.constant 0 : index
      %30 = vector.load %arg7[%c0_20, %c0_21] : memref<1x128xf32, #tpu.memory_space<vmem>>, vector<1x128xf32>
      %31 = vector.broadcast %30 : vector<1x128xf32> to vector<8x128xf32>
      %32 = arith.addf %29, %31 : vector<8x128xf32>
      %c0_22 = arith.constant 0 : index
      %c0_23 = arith.constant 0 : index
      %33 = vector.load %arg8[%c0_22, %c0_23] : memref<8x128xf32, #tpu.memory_space<vmem>>, vector<8x128xf32>
      tpu.vector_store %arg8[%c0_22, %c0_23], %32 {strides = array<i32>} : memref<8x128xf32, #tpu.memory_space<vmem>>, vector<8x128xf32>,
    } else {
    }
    return
  }
  func.func @transform_0(%arg0: i32, %arg1: i32) -> (i32, i32) {
    %c0_i32 = arith.constant 0 : i32
    %c0_i32_0 = arith.constant 0 : i32
    return %arg0, %c0_i32 : i32, i32
  }
  func.func @transform_1(%arg0: i32, %arg1: i32) -> (i32, i32) {
    %c0_i32 = arith.constant 0 : i32
    %c0_i32_0 = arith.constant 0 : i32
    return %arg0, %c0_i32 : i32, i32
  }
  func.func @transform_2(%arg0: i32, %arg1: i32) -> (i32, i32) {
    %c0_i32 = arith.constant 0 : i32
    %c0_i32_0 = arith.constant 0 : i32
    return %arg0, %c0_i32 : i32, i32
  }
  func.func @transform_3(%arg0: i32, %arg1: i32) -> (i32, i32) {
    %c0_i32 = arith.constant 0 : i32
    %c0_i32_0 = arith.constant 0 : i32
    return %arg1, %c0_i32 : i32, i32
  }
  func.func @transform_4(%arg0: i32, %arg1: i32) -> (i32, i32) {
    %c0_i32 = arith.constant 0 : i32
    %c0_i32_0 = arith.constant 0 : i32
    %c0_i32_1 = arith.constant 0 : i32
    return %c0_i32, %c0_i32_0 : i32, i32
  }
  func.func @transform_5(%arg0: i32, %arg1: i32) -> (i32, i32) {
    %c0_i32 = arith.constant 0 : i32
    %c0_i32_0 = arith.constant 0 : i32
    %c0_i32_1 = arith.constant 0 : i32
    return %c0_i32, %c0_i32_0 : i32, i32
  }
  func.func @transform_6(%arg0: i32, %arg1: i32) -> (i32, i32) {
    %c0_i32 = arith.constant 0 : i32
    %c0_i32_0 = arith.constant 0 : i32
    return %arg0, %c0_i32 : i32, i32
  }
}

</mosaic_0001>

<bundles_post_ra>
// kernel: tpu_custom_call.1
= control target key start
LH: loop header
LB: loop body
LE: loop exit
PB: predicated region body
PF: predicated region fallthrough
CT: control target
= control target key end

     0   :  { %11 = vsyncpa [#allocation4], 0  ;;  %s563_s0 = inlined_call_operand.vmem [shape: s32[8,1], index: 0, kind: input, shape index: {}]   ;;  %s564_s1 = inlined_call_operand.vmem [shape: s32[8,1], index: 1, kind: input, shape index: {}]   ;;  %s565_s2 = inlined_call_operand.vmem [shape: f32[8,1], index: 2, kind: input, shape index: {}]   ;;  %s566_s3 = inlined_call_operand.hbm [shape: f32[128,128], index: 3, kind: input, shape index: {}]   ;;  %s567_s4 = inlined_call_operand.hbm [shape: f32[128,128], index: 4, kind: input, shape index: {}]   ;;  %s568_s5 = inlined_call_operand.vmem [shape: f32[1,128], index: 5, kind: input, shape index: {}]   ;;  %s569_s6 = inlined_call_operand.hbm [shape: f32[8,128], index: 6, kind: output, shape index: {}]  }
   0x1   :  { %12 = vsyncpa [#allocation7], 0 }
   0x2   :  { %13 = vsyncpa [#allocation5], 0  ;;  %s465_s21 = smov [#allocation3]  }
   0x3   :  { %s25_s22 = sshll.u32 %s465_s21, 4  ;;  %s26_s22 = int_to_ptr.vmem [resolvable:$true] %s25_s22 }
   0x4   :  { %s407_s23 = scalar_lea.vmem %s26_s22, 2048  ;;  %p412_p1 = scmp.lt.s32.totalorder %s26_s22, %s26_s22 }
   0x5   :  { %p408_p0 = scmp.ne.s32.totalorder %s26_s22, %s407_s23  ;;  %p413_p2 = scmp.lt.s32.totalorder %s407_s23, %s407_s23 }
   0x7   :  { %p414_p3 = por %p413_p2, %p412_p1 }
   0x9   :  { %p415_p4 = pnand %p414_p3, %p408_p0 }
   0xb   :  { %418 = shalt.err (!%p415_p4)
}
   0xc   :  { %s466_s24 = smov 128   ;;  %s467_s25 = smov 8  }
   0xd   :  { %31 = dma.hbm_to_vmem [thread:$0]  %s566_s3, 2048, %s26_s22, [#allocation4], %s466_s24, %s466_s24, %s467_s25  }
   0xe   :  { %s468_s28 = smov [#allocation6]  }
   0xf   :  { %s37_s29 = sshll.u32 %s468_s28, 4  ;;  %s38_s29 = int_to_ptr.vmem [resolvable:$true] %s37_s29 }
  0x10   :  { %s427_s30 = scalar_lea.vmem %s38_s29, 2048  ;;  %p432_p6 = scmp.lt.s32.totalorder %s38_s29, %s38_s29 }
  0x11   :  { %p428_p5 = scmp.ne.s32.totalorder %s38_s29, %s427_s30  ;;  %p433_p7 = scmp.lt.s32.totalorder %s427_s30, %s427_s30 }
  0x13   :  { %p434_p8 = por %p433_p7, %p432_p6 }
  0x15   :  { %p435_p9 = pnand %p434_p8, %p428_p5 }
  0x17   :  { %438 = shalt.err (!%p435_p9)
}
  0x18   :  { %43 = dma.hbm_to_vmem [thread:$0]  %s567_s4, 2048, %s38_s29, [#allocation7], %s466_s24, %s466_s24, %s467_s25  }
  0x19   :  { %459 = dma.done.wait [#allocation4], 2048  }
  0x1a   :  { %460 = vsyncadd [#allocation4], 4294965248 }
  0x1b   :  { %461 = dma.done.wait [#allocation7], 2048  }
  0x1c   :  { %462 = vsyncadd [#allocation7], 4294965248  ;;  %v469_v0 = vmov 0   ;;  %v470_v1 = vmov 0.0   ;;  %v62_v2 = vld [vmem:[%s563_s0] sm:$0xff]  ;;  %v96_v4 = vld [vmem:[#allocation3 + $0x78] sm:$0xff]  ;;  %v57_v36 = vlaneseq }
  0x1d   :  { %397 = vset.pattern.permute.xlu0 %v469_v0  ;;  %398 = vset.pattern.permute.xlu1 %v469_v0  ;;  %v73_v3 = vld [vmem:[%s565_s2] sm:$0xff]  ;;  %v95_v5 = vld [vmem:[#allocation3 + $0x70] sm:$0xff]  ;;  %vm471_vm0 = vmmov 0   ;;  %v94_v7 = vld [vmem:[#allocation3 + $0x68] sm:$0xff]  ;;  %s472_s2 = smov [#allocation8]  }
  0x1e   :  { %319 = vmatprep.subr.mxu0 %v470_v1  ;;  %354 = vmatprep.subr.mxu1 %v470_v1  ;;  %v67_v6 = vld [vmem:[%s564_s1] sm:$0xff]  ;;  %v188_v9 = vld [vmem:[#allocation6 + $0x78] sm:$0xff]  ;;  %v187_v10 = vld [vmem:[#allocation6 + $0x70] sm:$0xff]  ;;  %v58_v38 = vand.u32 127, %v57_v36  ;;  %s273_s13 = sshll.u32 %s472_s2, 4  ;;  %s274_s13 = int_to_ptr.vmem [resolvable:$true] %s273_s13 }
  0x1f   :  { %64 = vperm.xlu0 %397, %v62_v2   ;;  %76 = vperm.xlu1 %398, %v73_v3   ;;  %v93_v8 = vld [vmem:[#allocation3 + $0x60] sm:$0xff]  ;;  %v92_v11 = vld [vmem:[#allocation3 + $0x58] sm:$0xff]  ;;  %v186_v12 = vld [vmem:[#allocation6 + $0x68] sm:$0xff]  ;;  %s439_s14 = scalar_lea.vmem %s274_s13, 128  ;;  %p444_p11 = scmp.lt.s32.totalorder %s274_s13, %s274_s13 }
  0x20   :  { %320 = vmatpush3.msra.mxu0 %v96_v4  ;;  %351 = vmatprep.mubr.msk.f32.mxu0 %vm471_vm0, %v470_v1  ;;  %v91_v13 = vld [vmem:[#allocation3 + $0x50] sm:$0xff]  ;;  %v185_v14 = vld [vmem:[#allocation6 + $0x60] sm:$0xff]  ;;  %v90_v15 = vld [vmem:[#allocation3 + $0x48] sm:$0xff]  ;;  %p440_p10 = scmp.ne.s32.totalorder %s274_s13, %s439_s14  ;;  %p445_p12 = scmp.lt.s32.totalorder %s439_s14, %s439_s14 }
  0x21   :  { %321 = vmatprep.subr.mxu0 %v470_v1  ;;  %386 = vmatprep.mubr.msk.f32.mxu1 %vm471_vm0, %v470_v1  ;;  %v184_v16 = vld [vmem:[#allocation6 + $0x58] sm:$0xff]  ;;  %v89_v17 = vld [vmem:[#allocation3 + $0x40] sm:$0xff]  ;;  %v183_v18 = vld [vmem:[#allocation6 + $0x50] sm:$0xff] }
  0x22   :  { %322 = vmatpush3.msra.mxu0 %v95_v5  ;;  %355 = vmatpush3.msra.mxu1 %v188_v9  ;;  %v88_v19 = vld [vmem:[#allocation3 + $0x38] sm:$0xff]  ;;  %v182_v20 = vld [vmem:[#allocation6 + $0x48] sm:$0xff]  ;;  %v87_v21 = vld [vmem:[#allocation3 + $0x30] sm:$0xff]  ;;  %p446_p13 = por %p445_p12, %p444_p11 }
  0x23   :  { %69 = vperm.xlu0 %397, %v67_v6   ;;  %323 = vmatprep.subr.mxu0 %v470_v1  ;;  %v181_v22 = vld [vmem:[#allocation6 + $0x40] sm:$0xff]  ;;  %v86_v23 = vld [vmem:[#allocation3 + $0x28] sm:$0xff]  ;;  %v180_v24 = vld [vmem:[#allocation6 + $0x38] sm:$0xff] }
  0x24   :  { %324 = vmatpush3.msra.mxu0 %v94_v7  ;;  %356 = vmatprep.subr.mxu1 %v470_v1  ;;  %v85_v25 = vld [vmem:[#allocation3 + $0x20] sm:$0xff]  ;;  %v179_v26 = vld [vmem:[#allocation6 + $0x30] sm:$0xff]  ;;  %v84_v27 = vld [vmem:[#allocation3 + $0x18] sm:$0xff]  ;;  %p447_p0 = pnand %p446_p13, %p440_p10 }
  0x25   :  { %325 = vmatprep.subr.mxu0 %v470_v1  ;;  %357 = vmatpush3.msra.mxu1 %v187_v10  ;;  %v178_v28 = vld [vmem:[#allocation6 + $0x28] sm:$0xff]  ;;  %v83_v29 = vld [vmem:[#allocation3 + $0x10] sm:$0xff]  ;;  %v177_v30 = vld [vmem:[#allocation6 + $0x20] sm:$0xff] }
  0x26   :  { %326 = vmatpush3.msra.mxu0 %v93_v8  ;;  %358 = vmatprep.subr.mxu1 %v470_v1  ;;  %v82_v31 = vld [vmem:[#allocation3 + $0x8] sm:$0xff]  ;;  %v176_v32 = vld [vmem:[#allocation6 + $0x18] sm:$0xff]  ;;  %v81_v33 = vld [vmem:[#allocation3] sm:$0xff] }
  0x27   :  { %327 = vmatprep.subr.mxu0 %v470_v1  ;;  %359 = vmatpush3.msra.mxu1 %v186_v12  ;;  %v175_v34 = vld [vmem:[#allocation6 + $0x10] sm:$0xff]  ;;  %v174_v35 = vld [vmem:[#allocation6 + $0x8] sm:$0xff]  ;;  %v173_v41 = vld [vmem:[#allocation6] sm:$0xff] }
  0x28   :  { %328 = vmatpush3.msra.mxu0 %v92_v11  ;;  %360 = vmatprep.subr.mxu1 %v470_v1  ;;  %v284_v44 = vld [vmem:[%s568_s5] ss:$0 sm:$0xff] }
  0x29   :  { %329 = vmatprep.subr.mxu0 %v470_v1  ;;  %361 = vmatpush3.msra.mxu1 %v185_v14 }
  0x2a   :  { %330 = vmatpush3.msra.mxu0 %v91_v13  ;;  %362 = vmatprep.subr.mxu1 %v470_v1 }
  0x2b   :  { %331 = vmatprep.subr.mxu0 %v470_v1  ;;  %363 = vmatpush3.msra.mxu1 %v184_v16 }
  0x2c   :  { %332 = vmatpush3.msra.mxu0 %v90_v15  ;;  %364 = vmatprep.subr.mxu1 %v470_v1 }
  0x2d   :  { %333 = vmatprep.subr.mxu0 %v470_v1  ;;  %365 = vmatpush3.msra.mxu1 %v183_v18 }
  0x2e   :  { %334 = vmatpush3.msra.mxu0 %v89_v17  ;;  %366 = vmatprep.subr.mxu1 %v470_v1 }
  0x2f   :  { %335 = vmatprep.subr.mxu0 %v470_v1  ;;  %367 = vmatpush3.msra.mxu1 %v182_v20 }
  0x30   :  { %336 = vmatpush3.msra.mxu0 %v88_v19  ;;  %368 = vmatprep.subr.mxu1 %v470_v1 }
  0x31   :  { %337 = vmatprep.subr.mxu0 %v470_v1  ;;  %369 = vmatpush3.msra.mxu1 %v181_v22 }
  0x32   :  { %338 = vmatpush3.msra.mxu0 %v87_v21  ;;  %370 = vmatprep.subr.mxu1 %v470_v1 }
  0x33   :  { %339 = vmatprep.subr.mxu0 %v470_v1  ;;  %371 = vmatpush3.msra.mxu1 %v180_v24 }
  0x34   :  { %340 = vmatpush3.msra.mxu0 %v86_v23  ;;  %372 = vmatprep.subr.mxu1 %v470_v1 }
  0x35   :  { %341 = vmatprep.subr.mxu0 %v470_v1  ;;  %373 = vmatpush3.msra.mxu1 %v179_v26 }
  0x36   :  { %342 = vmatpush3.msra.mxu0 %v85_v25  ;;  %374 = vmatprep.subr.mxu1 %v470_v1 }
  0x37   :  { %343 = vmatprep.subr.mxu0 %v470_v1  ;;  %375 = vmatpush3.msra.mxu1 %v178_v28 }
  0x38   :  { %344 = vmatpush3.msra.mxu0 %v84_v27  ;;  %376 = vmatprep.subr.mxu1 %v470_v1 }
  0x39   :  { %345 = vmatprep.subr.mxu0 %v470_v1  ;;  %377 = vmatpush3.msra.mxu1 %v177_v30 }
  0x3a   :  { %346 = vmatpush3.msra.mxu0 %v83_v29  ;;  %378 = vmatprep.subr.mxu1 %v470_v1 }
  0x3b   :  { %347 = vmatprep.subr.mxu0 %v470_v1  ;;  %379 = vmatpush3.msra.mxu1 %v176_v32 }
  0x3c   :  { %348 = vmatpush3.msra.mxu0 %v82_v31  ;;  %380 = vmatprep.subr.mxu1 %v470_v1 }
  0x3d   :  { %349 = vmatprep.subr.mxu0 %v470_v1  ;;  %381 = vmatpush3.msra.mxu1 %v175_v34 }
  0x3e   :  { %350 = vmatpush3.msra.mxu0 %v81_v33  ;;  %382 = vmatprep.subr.mxu1 %v470_v1 }
  0x3f   :  { %383 = vmatpush3.msra.mxu1 %v174_v35 }
  0x40   :  { %384 = vmatprep.subr.mxu1 %v470_v1 }
  0x41   :  { %385 = vmatpush3.msra.mxu1 %v173_v41 }
  0x9a   :  { %v65_v37 = vpop.permute.xlu0 %64  ;;  %v77_v40 = vpop.permute.xlu1 %76 }
  0x9b   :  { %vm66_vm1 = vcmp.ge.s32.totalorder %v58_v38, %v65_v37 }
  0x9e   :  { %v70_v39 = vpop.permute.xlu0 %69 }
  0x9f   :  { %vm71_vm2 = vcmp.lt.s32.totalorder %v58_v38, %v70_v39 }
  0xa0   :  { %vm72_vm3 = vmand %vm66_vm1, %vm71_vm2 }
  0xa1   :  { %352 = vmatmul.mubr.msk.f32.vlgmr.msra.gmra.mxu0 %vm72_vm3, %v77_v40 }
 0x161   :  { %v163_v42 = vpop.f32.mrf.mxu0 }
 0x162   :  { %387 = vmatmul.mubr.f32.vlgmr.msra.gmra.mxu1 %v163_v42 }
 0x163   :  { %v353_v43 = vpop.f32.mrf.mxu0 }
 0x222   :  { %v262_v45 = vpop.f32.mrf.mxu1 }
 0x223   :  { %v263_v46 = vadd.f32 %v284_v44, %v262_v45 }
 0x224   :  { %v388_v47 = vpop.f32.mrf.mxu1 }
 0x225   :  { %266 = vst [vmem:[#allocation8] sm:$0xff] %v263_v46 }
 0x226   :  { %450 = shalt.err (!%p447_p0)
}
 0x227   :  { %276 = dma.vmem_to_hbm [thread:$0]  %s274_s13, 128, %s569_s6, [#allocation5]  }
 0x228   :  { %463 = dma.done.wait [#allocation5], 128  }
 0x229   :  { %464 = vsyncadd [#allocation5], 4294967168 }
 0x22a   :  { %280 = vsyncpa [#allocation4], 1 }
 0x22b   :  { %281 = vsyncpa [#allocation7], 1 }
 0x22c   :  { %282 = vsyncpa [#allocation5], 1 }

</bundles_post_ra>
